<compile_context>
chip_gen: v7x
topology: tpu7x:2x2x1
jax: 0.10.0
libtpu: 0.0.40
codegen_flags: <defaults>
</compile_context>

<pallas_src>
import functools
import math

import jax
import jax.numpy as jnp
from jax.experimental import pallas as pl
from jax.experimental.pallas import tpu as pltpu


def _round_up(x, m):
    return ((x + m - 1) // m) * m


def _argmax_fwd_kernel(*refs, num_binary_dims, continuous_size):
    nb = num_binary_dims
    cont = continuous_size
    if cont > 0:
        fac_ref, cat_ref, cont_ref, noise_ref, out_ref, logp_ref = refs
    else:
        fac_ref, cat_ref, noise_ref, out_ref, logp_ref = refs
        cont_ref = None

    noise = noise_ref[...]                                   # [TB, 2*nb] f32
    tb, w = noise.shape

    # ---- decimal encoding: one int32 VPU multiply + one lane reduction.
    decimal = jnp.sum(cat_ref[...] * fac_ref[...], axis=-1, keepdims=True)  # [TB, 1]

    # ---- per-lane masks, entirely in the narrow [TB, 2*nb] domain.
    lane = jax.lax.broadcasted_iota(jnp.int32, (tb, w), 1)
    odd = jnp.bitwise_and(lane, 1) == 1                      # slot 2j+1 ?
    shift = (nb - 1) - (lane >> 1)                           # bit j of MSB-first code
    bit = jnp.bitwise_and(decimal, jnp.left_shift(jnp.int32(1), shift)) != 0
    is_max = bit != odd                                      # max slot: 2j if bit else 2j+1

    # ---- pair partner noise[l ^ 1] via two static lane rolls + parity select
    #      (lane slices + in-tile concatenation; XLU/VPU only, no MXU).
    partner = jnp.where(odd,
                        jnp.roll(noise, 1, axis=1),          # lane l -> noise[l-1]
                        jnp.roll(noise, -1, axis=1))         # lane l -> noise[l+1]
    new_noise = jnp.where(is_max, noise, noise * partner)    # min slot *= max value

    # ---- fused output [continuous | transformed noise]: one in-register lane
    #      concat + a single full-block store.
    if cont > 0:
        out_ref[...] = jnp.concatenate(
            [cont_ref[...], new_noise], axis=-1).astype(out_ref.dtype)
    else:
        out_ref[...] = new_noise.astype(out_ref.dtype)

    # rescaling_log_probs = -sum_j log(noise[max slot of pair j]);
    # dequantization_log_probs = 0 (uniform dequantizer)  =>
    # log_prob = sum_j log(max).  EUP work stays on the narrow [TB, 2*nb] slab.
    logp_ref[...] = jnp.sum(jnp.where(is_max, jnp.log(noise), 0.0),
                            axis=-1, keepdims=True)


def argmax_forward(inputs_continuous, inputs_categorical, noise,
                   category_factors, num_binary_dims, *, batch_tile=256):
    """Pallas ArgmaxBase.forward.

    Returns (outputs [B, continuous + 2*num_binary_dims], log_probs [B]).
    """
    B = inputs_categorical.shape[0]
    C = inputs_categorical.shape[1]
    cont = 0 if inputs_continuous is None else inputs_continuous.shape[1]
    nb = num_binary_dims
    w = 2 * nb
    out_w = cont + w

    # Batch tile: <= 256 rows (keeps narrow-lane vreg pressure low); for
    # mid-size batches force >= 4 grid steps so the "parallel" axis shards
    # across v7x's two TensorCores.  Per-step double-buffered VMEM at TB=256
    # is ~1.25 MiB (5 lane-padded blocks), fine for v5e's 16 MiB default.
    if B <= 16:
        tb = B
    else:
        tb = min(batch_tile, max(8, _round_up(pl.cdiv(B, 4), 8)))
    grid = (pl.cdiv(B, tb),)

    kernel = functools.partial(_argmax_fwd_kernel,
                               num_binary_dims=nb, continuous_size=cont)

    fac2d = jnp.asarray(category_factors, dtype=jnp.int32).reshape(1, C)

    in_specs = [pl.BlockSpec((1, C), lambda b: (0, 0)),        # category factors
                pl.BlockSpec((tb, C), lambda b: (b, 0))]       # categorical inputs
    operands = [fac2d, inputs_categorical.astype(jnp.int32)]
    if cont > 0:
        in_specs.append(pl.BlockSpec((tb, cont), lambda b: (b, 0)))
        operands.append(inputs_continuous.astype(jnp.float32))
    in_specs.append(pl.BlockSpec((tb, w), lambda b: (b, 0)))   # interleaved noise
    operands.append(noise.astype(jnp.float32))

    grid_spec = pltpu.PrefetchScalarGridSpec(
        num_scalar_prefetch=0,
        grid=grid,
        in_specs=in_specs,
        out_specs=[
            pl.BlockSpec((tb, out_w), lambda b: (b, 0)),
            pl.BlockSpec((tb, 1), lambda b: (b, 0)),
        ],
    )

    out, logp = pl.pallas_call(
        kernel,
        grid_spec=grid_spec,
        out_shape=[
            jax.ShapeDtypeStruct((B, out_w), jnp.float32),
            jax.ShapeDtypeStruct((B, 1), jnp.float32),
        ],
        compiler_params=pltpu.CompilerParams(
            dimension_semantics=("parallel",)),
    )(*operands)
    return out, logp[:, 0]


if __name__ == "__main__":
    key = jax.random.PRNGKey(0)

    # module configuration (small, consistent with ArgmaxBase.__init__)
    num_categories_per_dim = jnp.array([3, 4], dtype=jnp.int32)
    continuous_size = 5
    B = 64                     # -> tile 16, grid (4,): exercises the parallel grid

    num_categories = int(jnp.prod(num_categories_per_dim))
    nb = max(1, math.ceil(math.log2(num_categories)))           # num_binary_dims_
    factors = [1]
    for i in range(1, num_categories_per_dim.shape[0]):
        factors.append(factors[-1] * int(num_categories_per_dim[i - 1]))
    category_factors = jnp.array(factors, dtype=jnp.int32)      # category_factors_

    k1, k2, k3 = jax.random.split(key, 3)
    inputs_continuous = jax.random.normal(k1, (B, continuous_size), dtype=jnp.float32)
    inputs_categorical = jnp.stack(
        [jax.random.randint(jax.random.fold_in(k2, i), (B,), 0,
                            int(num_categories_per_dim[i]))
         for i in range(num_categories_per_dim.shape[0])], axis=-1)
    # uniform dequantization noise in (0, 1) (stands in for _sample_dequantizer)
    noise = jax.random.uniform(k3, (B, 2 * nb), dtype=jnp.float32,
                               minval=1e-3, maxval=1.0)

    out, logp = argmax_forward(inputs_continuous, inputs_categorical, noise,
                               category_factors, nb)
    jax.block_until_ready((out, logp))

    # pure-JAX reference (mirrors the PyTorch forward semantics)
    decimal = jnp.sum(category_factors[None, :] * inputs_categorical, axis=-1)
    binary_mask = 2 ** jnp.arange(nb - 1, -1, -1)
    bits = (decimal[:, None] & binary_mask[None, :]) != 0
    nv = noise.reshape(B, nb, 2)
    nmax = jnp.where(bits, nv[..., 0], nv[..., 1])
    out0 = jnp.where(bits, nv[..., 0], nv[..., 0] * nmax)
    out1 = jnp.where(bits, nv[..., 1] * nmax, nv[..., 1])
    ref_noise = jnp.stack([out0, out1], axis=-1).reshape(B, 2 * nb)
    ref_out = jnp.concatenate([inputs_continuous, ref_noise], axis=1)
    ref_logp = jnp.sum(jnp.log(nmax), axis=-1)   # 0 - rescaling_log_probs

    assert jnp.allclose(out, ref_out, atol=1e-6, rtol=1e-6), "output mismatch"
    assert jnp.allclose(logp, ref_logp, atol=1e-5, rtol=1e-5), "log-prob mismatch"
    print("KERNEL_OK")
</pallas_src>

<mosaic_0001>
module attributes {stable_mosaic.version = 11 : i64} {
  func.func @_argmax_fwd_kernel(%arg0: i32, %arg1: memref<1x2xi32, #tpu.memory_space<vmem>>, %arg2: memref<16x2xi32, #tpu.memory_space<vmem>>, %arg3: memref<16x5xf32, #tpu.memory_space<vmem>>, %arg4: memref<16x8xf32, #tpu.memory_space<vmem>>, %arg5: memref<16x13xf32, #tpu.memory_space<vmem>>, %arg6: memref<16x1xf32, #tpu.memory_space<vmem>>) attributes {dimension_semantics = [#tpu.dimension_semantics<parallel>], iteration_bounds = array<i64: 4>, scalar_prefetch = 0 : i64, scratch_operands = 0 : i64, tpu.core_type = #tpu.core_type<tc>, window_params = [{pipeline_mode = #tpu.pipeline_mode<synchronous>, transform_indices = @transform_0, window_bounds = array<i64: 1, 2>}, {transform_indices = @transform_1, window_bounds = array<i64: 16, 2>}, {transform_indices = @transform_2, window_bounds = array<i64: 16, 5>}, {transform_indices = @transform_3, window_bounds = array<i64: 16, 8>}, {transform_indices = @transform_4, window_bounds = array<i64: 16, 13>}, {transform_indices = @transform_5, window_bounds = array<i64: 16, 1>}]} {
    %c0 = arith.constant 0 : index
    %c0_0 = arith.constant 0 : index
    %0 = vector.load %arg4[%c0, %c0_0] : memref<16x8xf32, #tpu.memory_space<vmem>>, vector<16x8xf32>
    %c0_1 = arith.constant 0 : index
    %c0_2 = arith.constant 0 : index
    %1 = vector.load %arg2[%c0_1, %c0_2] : memref<16x2xi32, #tpu.memory_space<vmem>>, vector<16x2xi32>
    %c0_3 = arith.constant 0 : index
    %c0_4 = arith.constant 0 : index
    %2 = vector.load %arg1[%c0_3, %c0_4] : memref<1x2xi32, #tpu.memory_space<vmem>>, vector<1x2xi32>
    %3 = vector.broadcast %2 : vector<1x2xi32> to vector<16x2xi32>
    %4 = arith.muli %1, %3 : vector<16x2xi32>
    %cst = arith.constant dense<0> : vector<16xi32>
    %5 = vector.multi_reduction <add>, %4, %cst [1] : vector<16x2xi32> to vector<16xi32>
    %6 = vector.shape_cast %5 : vector<16xi32> to vector<16x1xi32>
    %7 = tpu.iota {dimensions = array<i32: 1>} : vector<16x8xi32>
    %c1_i32 = arith.constant 1 : i32
    %8 = vector.broadcast %c1_i32 : i32 to vector<16x8xi32>
    %9 = arith.andi %7, %8 : vector<16x8xi32>
    %c1_i32_5 = arith.constant 1 : i32
    %10 = vector.broadcast %c1_i32_5 : i32 to vector<16x8xi32>
    %11 = arith.cmpi eq, %9, %10 : vector<16x8xi32>
    %c1_i32_6 = arith.constant 1 : i32
    %12 = vector.broadcast %c1_i32_6 : i32 to vector<16x8xi32>
    %13 = arith.shrsi %7, %12 : vector<16x8xi32>
    %c3_i32 = arith.constant 3 : i32
    %14 = vector.broadcast %c3_i32 : i32 to vector<16x8xi32>
    %15 = arith.subi %14, %13 : vector<16x8xi32>
    %c1_i32_7 = arith.constant 1 : i32
    %16 = vector.broadcast %c1_i32_7 : i32 to vector<16x8xi32>
    %17 = arith.shli %16, %15 : vector<16x8xi32>
    %18 = vector.broadcast %6 : vector<16x1xi32> to vector<16x8xi32>
    %19 = arith.andi %18, %17 : vector<16x8xi32>
    %c0_i32 = arith.constant 0 : i32
    %20 = vector.broadcast %c0_i32 : i32 to vector<16x8xi32>
    %21 = arith.cmpi ne, %19, %20 : vector<16x8xi32>
    %22 = arith.xori %21, %11 : vector<16x8xi1>
    %23 = vector.extract_strided_slice %0 {offsets = [0, 7], sizes = [16, 1], strides = [1, 1]} : vector<16x8xf32> to vector<16x1xf32>
    %24 = vector.extract_strided_slice %0 {offsets = [0, 0], sizes = [16, 7], strides = [1, 1]} : vector<16x8xf32> to vector<16x7xf32>
    %25 = tpu.concatenate %23, %24 in 1 : vector<16x1xf32>, vector<16x7xf32> -> vector<16x8xf32>
    %26 = vector.extract_strided_slice %0 {offsets = [0, 1], sizes = [16, 7], strides = [1, 1]} : vector<16x8xf32> to vector<16x7xf32>
    %27 = vector.extract_strided_slice %0 {offsets = [0, 0], sizes = [16, 1], strides = [1, 1]} : vector<16x8xf32> to vector<16x1xf32>
    %28 = tpu.concatenate %26, %27 in 1 : vector<16x7xf32>, vector<16x1xf32> -> vector<16x8xf32>
    %29 = arith.select %11, %25, %28 : vector<16x8xi1>, vector<16x8xf32>
    %30 = arith.mulf %0, %29 : vector<16x8xf32>
    %31 = arith.select %22, %0, %30 : vector<16x8xi1>, vector<16x8xf32>
    %c0_8 = arith.constant 0 : index
    %c0_9 = arith.constant 0 : index
    %32 = vector.load %arg3[%c0_8, %c0_9] : memref<16x5xf32, #tpu.memory_space<vmem>>, vector<16x5xf32>
    %33 = tpu.concatenate %32, %31 in 1 : vector<16x5xf32>, vector<16x8xf32> -> vector<16x13xf32>
    %c0_10 = arith.constant 0 : index
    %c0_11 = arith.constant 0 : index
    %34 = vector.load %arg5[%c0_10, %c0_11] : memref<16x13xf32, #tpu.memory_space<vmem>>, vector<16x13xf32>
    tpu.vector_store %arg5[%c0_10, %c0_11], %33 {strides = array<i32>} : memref<16x13xf32, #tpu.memory_space<vmem>>, vector<16x13xf32>,
    %35 = math.log %0 : vector<16x8xf32>
    %cst_12 = arith.constant 0.000000e+00 : f32
    %36 = vector.broadcast %cst_12 : f32 to vector<16x8xf32>
    %37 = arith.select %22, %35, %36 : vector<16x8xi1>, vector<16x8xf32>
    %cst_13 = arith.constant dense<0.000000e+00> : vector<16xf32>
    %38 = vector.multi_reduction <add>, %37, %cst_13 [1] : vector<16x8xf32> to vector<16xf32>
    %39 = vector.shape_cast %38 : vector<16xf32> to vector<16x1xf32>
    %c0_14 = arith.constant 0 : index
    %c0_15 = arith.constant 0 : index
    %40 = vector.load %arg6[%c0_14, %c0_15] : memref<16x1xf32, #tpu.memory_space<vmem>>, vector<16x1xf32>
    tpu.vector_store %arg6[%c0_14, %c0_15], %39 {strides = array<i32>} : memref<16x1xf32, #tpu.memory_space<vmem>>, vector<16x1xf32>,
    return
  }
  func.func @transform_0(%arg0: i32) -> (i32, i32) {
    %c0_i32 = arith.constant 0 : i32
    %c0_i32_0 = arith.constant 0 : i32
    %c0_i32_1 = arith.constant 0 : i32
    return %c0_i32, %c0_i32_0 : i32, i32
  }
  func.func @transform_1(%arg0: i32) -> (i32, i32) {
    %c0_i32 = arith.constant 0 : i32
    %c0_i32_0 = arith.constant 0 : i32
    return %arg0, %c0_i32 : i32, i32
  }
  func.func @transform_2(%arg0: i32) -> (i32, i32) {
    %c0_i32 = arith.constant 0 : i32
    %c0_i32_0 = arith.constant 0 : i32
    return %arg0, %c0_i32 : i32, i32
  }
  func.func @transform_3(%arg0: i32) -> (i32, i32) {
    %c0_i32 = arith.constant 0 : i32
    %c0_i32_0 = arith.constant 0 : i32
    return %arg0, %c0_i32 : i32, i32
  }
  func.func @transform_4(%arg0: i32) -> (i32, i32) {
    %c0_i32 = arith.constant 0 : i32
    %c0_i32_0 = arith.constant 0 : i32
    return %arg0, %c0_i32 : i32, i32
  }
  func.func @transform_5(%arg0: i32) -> (i32, i32) {
    %c0_i32 = arith.constant 0 : i32
    %c0_i32_0 = arith.constant 0 : i32
    return %arg0, %c0_i32 : i32, i32
  }
}

</mosaic_0001>

<bundles_post_ra>
// kernel: tpu_custom_call.1
= control target key start
LH: loop header
LB: loop body
LE: loop exit
PB: predicated region body
PF: predicated region fallthrough
CT: control target
= control target key end

     0   :  { %s600_s18 = smov 0   ;;  %s702_s0 = inlined_call_operand.vmem [shape: s32[1,2], index: 0, kind: input, shape index: {}]   ;;  %s703_s1 = inlined_call_operand.vmem [shape: s32[64,2], index: 1, kind: input, shape index: {}]   ;;  %s704_s2 = inlined_call_operand.vmem [shape: f32[64,5], index: 2, kind: input, shape index: {}]   ;;  %s705_s3 = inlined_call_operand.vmem [shape: f32[64,8], index: 3, kind: input, shape index: {}]   ;;  %s706_s4 = inlined_call_operand.vmem [shape: f32[64,13], index: 4, kind: output, shape index: {0}]   ;;  %s707_s5 = inlined_call_operand.vmem [shape: f32[64,1], index: 5, kind: output, shape index: {1}]  }
   0x1 LB: > { %s520_s19 = sadd.s32 4294967295, %s562_s18   ;;  %p524_p0 = scmp.ge.s32.totalorder %s562_s18, 1  ;;  %s562_s18 = sphi %s600_s18, %s16_s18  }
   0x2   : > { %p213_p1 = scmp.lt.s32.totalorder %s562_s18, 5 }
   0x4   : > { %p214_p2 = pnand %p524_p0, %p213_p1 }
   0x5   : > { %s525_s20 = sshll.u32 (!%p214_p2), %s520_s19, 1  ;;  %v535_v0 = vld [vmem:[%s702_s0] ss:$0 sm:$0xff] (!%p214_p2)  ;;  %vm297_vm0 = vcmask (!%p214_p2), 15360   ;;  %s564_s30 = smov (!%p214_p2), 1   ;;  %v324_v17 = vlaneseq (!%p214_p2)  ;;  %v568_v27 = vmov (!%p214_p2), 1  }
   0x6   : > { %217 = sbr.rel (%p214_p2) target bundleno = 330 (0x14a), region = 36  ;;  %p257_p3 = scmp.lt.s32.totalorder (!%p214_p2), %s525_s20, 7  ;;  %vm397_vm3 = vcmask (!%p214_p2), 64512   ;;  %vm351_vm7 = vcmask (!%p214_p2), 7168   ;;  %vm366_vm8 = vcmask (!%p214_p2), 56320   ;;  %vm385_vm9 = vcmask (!%p214_p2), 39936  }
   0x7   : > { %s565_s6 = smov (!%p214_p2), 127   ;;  %s566_s7 = smov (!%p214_p2), 121   ;;  %v325_v18 = vand.u32 (!%p214_p2), 127, %v324_v17  ;;  %vm388_vm10 = vcmask (!%p214_p2), 105472  }
   0x8   : > { %s567_s8 = smov (!%p214_p2), 7   ;;  %s569_s9 = smov (!%p214_p2), 5  }
   0x9   : > { %v328_v19 = vshra.s32 (!%p214_p2), %v325_v18, 1  ;;  %v326_v26 = vand.u32 (!%p214_p2), 1, %v325_v18 }
   0xb   : > { %v329_v20 = vsub.s32 (!%p214_p2), 3, %v328_v19  ;;  %vm635_vm1 = vcmp.eq.s32.totalorder (!%p214_p2), %v326_v26, 1 }
   0xd   : > { %s715_s20 = smov (!%p257_p3, %s525_s20), 7  ;;  %v330_v28 = vshll.u32 %v568_v27, %v329_v20 }
   0xe   : > { %s608_s21 = sshll.u32 %s715_s20, 3 }
   0xf   : > { %s260_s26 = scalar_lea.vmem %s703_s1, %s608_s21  ;;  %s272_s29 = scalar_lea.vmem %s705_s3, %s608_s21 }
  0x10   : > { %v288_v1 = vld [vmem:[%s260_s26] sm:$0xff]  ;;  %v289_v2 = vld [vmem:[%s260_s26 + $0x8] sm:$0xff]  ;;  %s284_s12 = scalar_lea.vmem %s707_s5, %s608_s21  ;;  %s266_s15 = scalar_lea.vmem %s704_s2, %s608_s21 }
  0x11   : > { %v295_v3 = vmul.u32 %v535_v0, %v288_v1  ;;  %v296_v4 = vmul.u32 %v535_v0, %v289_v2  ;;  %v621_v15 = vld [vmem:[%s272_s29] sm:$0xff]  ;;  %v626_v16 = vld [vmem:[%s272_s29 + $0x8] sm:$0xff]  ;;  %s278_s19 = scalar_lea.vmem %s706_s4, %s608_s21 }
  0x12   : > { %552 = vlog2.f32 %v621_v15 }
  0x13   : > { %v298_v5 = vsel %vm297_vm0, %v295_v3, 0  ;;  %v311_v6 = vsel %vm297_vm0, %v296_v4, 0  ;;  %554 = vlog2.f32 %v626_v16  ;;  %v375_v4 = vld [vmem:[%s266_s15] sm:$0xff] }
  0x14   : > { %v300_v7 = vshrl.u32 %v298_v5, 16  ;;  %v299_v8 = vand.u32 65535, %v298_v5  ;;  %v313_v9 = vshrl.u32 %v311_v6, 16  ;;  %v312_v10 = vand.u32 65535, %v311_v6 }
  0x16   : > { %v302_v11 = vcvt.s32.f32 %v300_v7  ;;  %v301_v12 = vcvt.s32.f32 %v299_v8  ;;  %v315_v13 = vcvt.s32.f32 %v313_v9  ;;  %v314_v14 = vcvt.s32.f32 %v312_v10  ;;  %v376_v8 = vld [vmem:[%s266_s15 + $0x8] sm:$0xff] }
  0x18   : > { %305 = vadd.xlane.f32.xlu0 %v302_v11  ;;  %303 = vadd.xlane.f32.xlu1 %v301_v12 }
  0x1c   : > { %318 = vadd.xlane.f32.xlu0 %v315_v13  ;;  %316 = vadd.xlane.f32.xlu1 %v314_v14  ;;  %v553_v29 = vpop.eup %552 }
  0x1d   : > { %v392_v38 = vmul.f32 0.6931472, %v553_v29  ;;  %v555_v39 = vpop.eup %554 }
  0x1e   : > { %v394_v46 = vmul.f32 0.6931472, %v555_v39 }
  0x2d   : > { %345 = vrot.lane.b32.xlu1 %v621_v15, %s564_s30 }
  0x31   : > { %354 = vrot.lane.b32.xlu1 %v621_v15, %s565_s6 }
  0x32   : > { %339 = vrot.lane.b32.xlu0 %v621_v15, %s566_s7 }
  0x35   : > { %360 = vrot.lane.b32.xlu1 %v621_v15, %s567_s8 }
  0x36   : > { %341 = vrot.lane.b32.xlu0 %v626_v16, %s566_s7 }
  0x39   : > { %347 = vrot.lane.b32.xlu1 %v626_v16, %s564_s30 }
  0x3a   : > { %356 = vrot.lane.b32.xlu0 %v626_v16, %s565_s6 }
  0x3d   : > { %362 = vrot.lane.b32.xlu1 %v626_v16, %s567_s8 }
  0xa5   : > { %v306_v21 = vpop.xlane.xlu0 %305  ;;  %v304_v22 = vpop.xlane.xlu1 %303 }
  0xa6   : > { %v308_v23 = vcvt.f32.s32 %v306_v21  ;;  %v307_v24 = vcvt.f32.s32 %v304_v22 }
  0xa8   : > { %v309_v25 = vshll.u32 %v308_v23, 16 }
  0xa9   : > { %v319_v30 = vpop.xlane.xlu0 %318  ;;  %v317_v31 = vpop.xlane.xlu1 %316 }
  0xaa   : > { %v310_v32 = vadd.s32 %v309_v25, %v307_v24  ;;  %v321_v33 = vcvt.f32.s32 %v319_v30  ;;  %v320_v34 = vcvt.f32.s32 %v317_v31 }
  0xac   : > { %v322_v35 = vshll.u32 %v321_v33, 16  ;;  %v331_v37 = vand.u32 %v330_v28, %v310_v32 }
  0xad   : > { %v346_v40 = vpop.permute.xlu1 %345  ;;  %v340_v43 = vpop.permute.xlu0 %339 }
  0xae   : > { %v323_v41 = vadd.s32 %v322_v35, %v320_v34  ;;  %vm639_vm2 = vcmp.ne.s32.totalorder %v331_v37, 0  ;;  %v352_v57 = vsel %vm351_vm7, %v340_v43, %v346_v40 }
  0xaf   : > { %vm335_vm4 = vmxor %vm639_vm2, %vm635_vm1 }
  0xb0   : > { %v395_v44 = vsel %vm335_vm4, %v392_v38, 0.0  ;;  %v332_v45 = vand.u32 %v330_v28, %v323_v41 }
  0xb1   : > { %v355_v47 = vpop.permute.xlu1 %354  ;;  %v398_v48 = vsel %vm397_vm3, %v395_v44, 0.0  ;;  %v342_v53 = vpop.permute.xlu0 %341 }
  0xb2   : > { %399 = vadd.xlane.f32.xlu0 %v398_v48  ;;  %vm652_vm5 = vcmp.ne.s32.totalorder %v332_v45, 0 }
  0xb3   : > { %vm336_vm6 = vmxor %vm652_vm5, %vm635_vm1 }
  0xb4   : > { %v396_v50 = vsel %vm336_vm6, %v394_v46, 0.0 }
  0xb5   : > { %v361_v51 = vpop.permute.xlu1 %360  ;;  %v401_v52 = vsel %vm397_vm3, %v396_v50, 0.0  ;;  %v357_v55 = vpop.permute.xlu0 %356 }
  0xb6   : > { %402 = vadd.xlane.f32.xlu1 %v401_v52  ;;  %v367_v58 = vsel %vm366_vm8, %v355_v47, %v361_v51 }
  0xb7   : > { %v369_v62 = vsel %vm635_vm1, %v352_v57, %v367_v58 }
  0xb8   : > { %v371_v0 = vmul.f32 %v369_v62, %v621_v15 }
  0xb9   : > { %v348_v54 = vpop.permute.xlu1 %347 }
  0xba   : > { %v353_v56 = vsel %vm351_vm7, %v342_v53, %v348_v54  ;;  %v373_v2 = vsel %vm335_vm4, %v621_v15, %v371_v0 }
  0xbd   : > { %v363_v59 = vpop.permute.xlu1 %362 }
  0xbe   : > { %v368_v60 = vsel %vm366_vm8, %v357_v55, %v363_v59 }
  0xbf   : > { %v370_v61 = vsel %vm635_vm1, %v353_v56, %v368_v60 }
  0xc0   : > { %v372_v63 = vmul.f32 %v370_v61, %v626_v16 }
  0xc2   : > { %v374_v1 = vsel %vm336_vm6, %v626_v16, %v372_v63 }
  0xc7   : > { %381 = vrot.lane.b32.xlu1 %v374_v1, %s569_s9 }
  0xc8   : > { %379 = vrot.lane.b32.xlu0 %v373_v2, %s569_s9 }
 0x13f   : > { %v400_v3 = vpop.xlane.xlu0 %399 }
 0x140   : > { %404 = vst.msk [vmem:[%s284_s12] sm:$0xff] %vm351_vm7, %v400_v3 }
 0x143   : > { %v380_v5 = vpop.permute.xlu0 %379  ;;  %v403_v6 = vpop.xlane.xlu1 %402 }
 0x144   : > { %v386_v7 = vsel %vm385_vm9, %v375_v4, %v380_v5  ;;  %405 = vst.msk [vmem:[%s284_s12 + $0x8] sm:$0xff] %vm351_vm7, %v403_v6 }
 0x145   : > { %389 = vst.msk [vmem:[%s278_s19] sm:$0xff] %vm388_vm10, %v386_v7 }
 0x147   : > { %v382_v9 = vpop.permute.xlu1 %381 }
 0x148   : > { %v387_v10 = vsel %vm385_vm9, %v376_v8, %v382_v9 }
 0x149   : > { %390 = vst.msk [vmem:[%s278_s19 + $0x8] sm:$0xff] %vm388_vm10, %v387_v10 }
 0x14a PF: > { %s16_s18 = sadd.s32 1, %s562_s18  }
 0x14b   : > { %p13_p4 = scmp.ge.s32.totalorder %s16_s18, 6  }
 0x14d   :  { %15 = sbr.rel (!%p13_p4) target bundleno = 1 (0x1), region = 84 }

</bundles_post_ra>
